<compile_context>
chip_gen: v7x
topology: tpu7x:2x2x1
jax: 0.10.0
libtpu: 0.0.40
codegen_flags: <defaults>
</compile_context>

<pallas_src>
import jax
import jax.numpy as jnp
from jax.experimental import pallas as pl
from jax.experimental.pallas import tpu as pltpu

EPS = 1e-4  # eps used in batch_weighted_procrustes


# ----------------------------------------------------------------------------
# Pallas kernel: weighted means + weighted cross-covariance Sxy, batch-packed.
#   x_ref  : (bblk, 3, S)  X^T   (sampled source points, transposed)
#   y_ref  : (bblk, 3, S)  Y^T   (sampled target points, transposed)
#   w_ref  : (bblk, 1, S)  weights (zero on padded samples / padded batches)
#   out_ref: (bblk, 3, 8)  cols 0-2 = Sxy, col 3 = mean_X, col 4 = mean_Y,
#                          cols 5-7 unused (never read by the wrapper).
# ----------------------------------------------------------------------------
def _procrustes_stats_kernel(x_ref, y_ref, w_ref, out_ref):
    x = x_ref[...]                                           # (bblk, 3, S) f32
    y = y_ref[...]                                           # (bblk, 3, S) f32
    w = w_ref[...]                                           # (bblk, 1, S) f32

    w1 = jnp.sum(jnp.abs(w), axis=-1, keepdims=True)         # (bblk, 1, 1)
    w_norm = w * (1.0 / (w1 + EPS))                          # (bblk, 1, S)

    mean_x = jnp.sum(w_norm * x, axis=-1, keepdims=True)     # (bblk, 3, 1)
    mean_y = jnp.sum(w_norm * y, axis=-1, keepdims=True)     # (bblk, 3, 1)

    yc = y - mean_y                                          # (bblk, 3, S)
    xcw = w_norm * (x - mean_x)                              # (bblk, 3, S)

    # Sxy[:, i, j] = sum_s yc[:, i, s] * xcw[:, j, s]
    # VPU multiply + lane-axis (XLU) reduce; a 3xS . Sx3 MXU contraction would
    # waste the systolic array and force operand transposes.
    for j in range(3):
        out_ref[:, :, j:j + 1] = jnp.sum(
            yc * xcw[:, j:j + 1, :], axis=-1, keepdims=True)  # (bblk, 3, 1)
    out_ref[:, :, 3:4] = mean_x
    out_ref[:, :, 4:5] = mean_y


def procrustes_stats(x_t, y_t, w):
    """x_t, y_t: (B, 3, S) float32; w: (B, S) float32
    -> Sxy (B,3,3), mean_x (B,3,1), mean_y (B,3,1) (float32)."""
    B, _, S = x_t.shape

    # Pad S to a multiple of 128 with zero points / zero weights (lane-dense
    # vregs, aligned DMA rows; w=0 rows contribute nothing to the stats).
    s_pad = max(128, pl.cdiv(S, 128) * 128)
    if s_pad != S:
        x_t = jnp.pad(x_t, ((0, 0), (0, 0), (0, s_pad - S)))
        y_t = jnp.pad(y_t, ((0, 0), (0, 0), (0, s_pad - S)))
        w = jnp.pad(w, ((0, 0), (0, s_pad - S)))
    w3 = w[:, None, :]                                        # (B, 1, s_pad)

    # Batch-pack the grid: ~2 MiB of input per pipeline stage (x2 double
    # buffering + in-kernel temps stays well under v5e's 16 MiB scoped default
    # and v7x's 64 MiB physical VMEM), capped at 256 batches per block.
    bytes_per_batch = (3 + 3 + 1) * s_pad * 4
    budget = 2 * 1024 * 1024
    bblk = int(max(1, min(256, budget // bytes_per_batch)))
    n_steps = int(pl.cdiv(B, bblk))
    if B >= 16:
        n_steps = max(n_steps, 2)        # keep both v7x TensorCores busy
    bblk = int(pl.cdiv(B, n_steps))      # re-balance -> minimal batch padding
    b_pad = n_steps * bblk
    if b_pad != B:
        # Padded batches have w == 0 -> all stats are 0; sliced off below.
        x_t = jnp.pad(x_t, ((0, b_pad - B), (0, 0), (0, 0)))
        y_t = jnp.pad(y_t, ((0, b_pad - B), (0, 0), (0, 0)))
        w3 = jnp.pad(w3, ((0, b_pad - B), (0, 0), (0, 0)))

    out = pl.pallas_call(
        _procrustes_stats_kernel,
        out_shape=jax.ShapeDtypeStruct((b_pad, 3, 8), jnp.float32),
        grid_spec=pltpu.PrefetchScalarGridSpec(
            num_scalar_prefetch=0,
            grid=(n_steps,),
            in_specs=[
                pl.BlockSpec((bblk, 3, s_pad), lambda b: (b, 0, 0)),
                pl.BlockSpec((bblk, 3, s_pad), lambda b: (b, 0, 0)),
                pl.BlockSpec((bblk, 1, s_pad), lambda b: (b, 0, 0)),
            ],
            out_specs=pl.BlockSpec((bblk, 3, 8), lambda b: (b, 0, 0)),
        ),
        compiler_params=pltpu.CompilerParams(
            dimension_semantics=("parallel",),       # independent batches
            vmem_limit_bytes=32 * 1024 * 1024),
        cost_estimate=pl.CostEstimate(
            flops=40 * b_pad * s_pad,
            transcendentals=0,
            bytes_accessed=bytes_per_batch * b_pad + 96 * b_pad),
    )(x_t, y_t, w3)

    out = out[:B]
    sxy = out[:, :, 0:3]
    mean_x = out[:, :, 3:4]
    mean_y = out[:, :, 4:5]
    return sxy, mean_x, mean_y


# ----------------------------------------------------------------------------
# Glue (plain JAX): sampling, top-k, SVD orthogonalisation
# ----------------------------------------------------------------------------
def _det3(m):
    return (m[..., 0, 0] * (m[..., 1, 1] * m[..., 2, 2] - m[..., 1, 2] * m[..., 2, 1])
            - m[..., 0, 1] * (m[..., 1, 0] * m[..., 2, 2] - m[..., 1, 2] * m[..., 2, 0])
            + m[..., 0, 2] * (m[..., 1, 0] * m[..., 2, 1] - m[..., 1, 1] * m[..., 2, 0]))


def soft_procrustes_forward(conf_matrix, src_pcd, tgt_pcd, src_mask, tgt_mask,
                            sample_rate=0.5, max_condition_num=30.0):
    bsize, N, M = conf_matrix.shape

    src_len = jnp.sum(src_mask.astype(jnp.int32), axis=1)
    tgt_len = jnp.sum(tgt_mask.astype(jnp.int32), axis=1)
    entry_max = jnp.maximum(src_len, tgt_len)
    entry_max = (entry_max.astype(jnp.float32) * sample_rate).astype(jnp.int32)
    # Matches the reference (mean over batch); data-dependent -> host value,
    # so this wrapper runs un-jitted. Guard against 0 (empty masks).
    sample_n_points = max(1, int(jnp.mean(entry_max.astype(jnp.float32))))

    conf_flat = conf_matrix.reshape(bsize, -1)
    w, idx = jax.lax.top_k(conf_flat, sample_n_points)          # descending top-k
    idx_src = idx // M
    idx_tgt = idx % M

    # Gather straight into the (B, 3, S) layout the kernel wants: no packed
    # concat and no transpose of the gathered result -> no extra HBM round trip.
    src_t = jnp.swapaxes(src_pcd.astype(jnp.float32), 1, 2)     # (B, 3, N)
    tgt_t = jnp.swapaxes(tgt_pcd.astype(jnp.float32), 1, 2)     # (B, 3, M)
    x_t = jnp.take_along_axis(src_t, idx_src[:, None, :], axis=2)   # (B, 3, S)
    y_t = jnp.take_along_axis(tgt_t, idx_tgt[:, None, :], axis=2)   # (B, 3, S)

    w_mask = jnp.arange(sample_n_points)[None, :] < entry_max[:, None]
    w = jnp.where(w_mask, w, 0.0).astype(jnp.float32)

    sxy, mean_x, mean_y = procrustes_stats(x_t, y_t, w)

    # TODO(synk): PyTorch runs the SVD on CPU in float64 inside try/except;
    # here we use float32 jnp.linalg.svd on device with no exception fallback.
    u, d, vh = jnp.linalg.svd(sxy)
    condition = d[:, 0] / d[:, 2]
    uv_det = _det3(u) * _det3(vh)                               # det(V) == det(V^T)
    s_diag = jnp.stack([jnp.ones_like(uv_det), jnp.ones_like(uv_det), uv_det], axis=-1)
    svt = s_diag[:, :, None] * vh                               # diag(S) @ V^T
    R = jnp.matmul(u, svt).astype(jnp.float32)                  # (B, 3, 3)
    t = mean_y - jnp.matmul(R, mean_x)                          # (B, 3, 1)

    solution_mask = condition < max_condition_num
    eye = jnp.broadcast_to(jnp.eye(3, dtype=R.dtype), R.shape)
    zeros_t = jnp.zeros_like(t)
    R_forwd = jnp.where(solution_mask[:, None, None], R, eye)
    t_forwd = jnp.where(solution_mask[:, None, None], t, zeros_t)

    return R, t, R_forwd, t_forwd, condition, solution_mask


# ----------------------------------------------------------------------------
if __name__ == "__main__":
    key = jax.random.PRNGKey(0)
    B, N, M = 2, 16, 16
    k1, k2, k3 = jax.random.split(key, 3)

    logits = jax.random.normal(k1, (B, N * M), dtype=jnp.float32)
    conf_matrix = jax.nn.softmax(logits, axis=-1).reshape(B, N, M)
    src_pcd = jax.random.normal(k2, (B, N, 3), dtype=jnp.float32)
    tgt_pcd = jax.random.normal(k3, (B, M, 3), dtype=jnp.float32) + 1.0
    src_mask = jnp.ones((B, N), dtype=bool)
    tgt_mask = jnp.ones((B, M), dtype=bool)

    outs = soft_procrustes_forward(conf_matrix, src_pcd, tgt_pcd, src_mask, tgt_mask,
                                   sample_rate=0.5, max_condition_num=30.0)
    jax.block_until_ready(outs)
    print("KERNEL_OK")
</pallas_src>

<mosaic_0001>
module attributes {stable_mosaic.version = 11 : i64} {
  func.func @_procrustes_stats_kernel(%arg0: i32, %arg1: memref<2x3x128xf32, #tpu.memory_space<vmem>>, %arg2: memref<2x3x128xf32, #tpu.memory_space<vmem>>, %arg3: memref<2x1x128xf32, #tpu.memory_space<vmem>>, %arg4: memref<2x3x8xf32, #tpu.memory_space<vmem>>) attributes {dimension_semantics = [#tpu.dimension_semantics<parallel>], iteration_bounds = array<i64: 1>, scalar_prefetch = 0 : i64, scratch_operands = 0 : i64, tpu.core_type = #tpu.core_type<tc>, window_params = [{transform_indices = @transform_0, window_bounds = array<i64: 2, 3, 128>}, {transform_indices = @transform_1, window_bounds = array<i64: 2, 3, 128>}, {transform_indices = @transform_2, window_bounds = array<i64: 2, 1, 128>}, {transform_indices = @transform_3, window_bounds = array<i64: 2, 3, 8>}]} {
    %c0 = arith.constant 0 : index
    %c0_0 = arith.constant 0 : index
    %c0_1 = arith.constant 0 : index
    %0 = vector.load %arg1[%c0, %c0_0, %c0_1] : memref<2x3x128xf32, #tpu.memory_space<vmem>>, vector<2x3x128xf32>
    %c0_2 = arith.constant 0 : index
    %c0_3 = arith.constant 0 : index
    %c0_4 = arith.constant 0 : index
    %1 = vector.load %arg2[%c0_2, %c0_3, %c0_4] : memref<2x3x128xf32, #tpu.memory_space<vmem>>, vector<2x3x128xf32>
    %c0_5 = arith.constant 0 : index
    %c0_6 = arith.constant 0 : index
    %c0_7 = arith.constant 0 : index
    %2 = vector.load %arg3[%c0_5, %c0_6, %c0_7] : memref<2x1x128xf32, #tpu.memory_space<vmem>>, vector<2x1x128xf32>
    %3 = math.absf %2 : vector<2x1x128xf32>
    %cst = arith.constant dense<0.000000e+00> : vector<2x1xf32>
    %4 = vector.multi_reduction <add>, %3, %cst [2] : vector<2x1x128xf32> to vector<2x1xf32>
    %5 = vector.shape_cast %4 : vector<2x1xf32> to vector<2x1x1xf32>
    %cst_8 = arith.constant 9.99999974E-5 : f32
    %6 = vector.broadcast %cst_8 : f32 to vector<2x1x1xf32>
    %7 = arith.addf %5, %6 : vector<2x1x1xf32>
    %cst_9 = arith.constant 1.000000e+00 : f32
    %8 = vector.broadcast %cst_9 : f32 to vector<2x1x1xf32>
    %9 = arith.divf %8, %7 : vector<2x1x1xf32>
    %10 = vector.broadcast %9 : vector<2x1x1xf32> to vector<2x1x128xf32>
    %11 = arith.mulf %2, %10 : vector<2x1x128xf32>
    %12 = vector.broadcast %11 : vector<2x1x128xf32> to vector<2x3x128xf32>
    %13 = arith.mulf %12, %0 : vector<2x3x128xf32>
    %cst_10 = arith.constant dense<0.000000e+00> : vector<2x3xf32>
    %14 = vector.multi_reduction <add>, %13, %cst_10 [2] : vector<2x3x128xf32> to vector<2x3xf32>
    %15 = vector.shape_cast %14 : vector<2x3xf32> to vector<2x3x1xf32>
    %16 = vector.broadcast %11 : vector<2x1x128xf32> to vector<2x3x128xf32>
    %17 = arith.mulf %16, %1 : vector<2x3x128xf32>
    %cst_11 = arith.constant dense<0.000000e+00> : vector<2x3xf32>
    %18 = vector.multi_reduction <add>, %17, %cst_11 [2] : vector<2x3x128xf32> to vector<2x3xf32>
    %19 = vector.shape_cast %18 : vector<2x3xf32> to vector<2x3x1xf32>
    %20 = vector.broadcast %19 : vector<2x3x1xf32> to vector<2x3x128xf32>
    %21 = arith.subf %1, %20 : vector<2x3x128xf32>
    %22 = vector.broadcast %15 : vector<2x3x1xf32> to vector<2x3x128xf32>
    %23 = arith.subf %0, %22 : vector<2x3x128xf32>
    %24 = vector.broadcast %11 : vector<2x1x128xf32> to vector<2x3x128xf32>
    %25 = arith.mulf %24, %23 : vector<2x3x128xf32>
    %26 = vector.extract_strided_slice %25 {offsets = [0, 0, 0], sizes = [2, 1, 128], strides = [1, 1, 1]} : vector<2x3x128xf32> to vector<2x1x128xf32>
    %27 = vector.broadcast %26 : vector<2x1x128xf32> to vector<2x3x128xf32>
    %28 = arith.mulf %21, %27 : vector<2x3x128xf32>
    %cst_12 = arith.constant dense<0.000000e+00> : vector<2x3xf32>
    %29 = vector.multi_reduction <add>, %28, %cst_12 [2] : vector<2x3x128xf32> to vector<2x3xf32>
    %30 = vector.shape_cast %29 : vector<2x3xf32> to vector<2x3x1xf32>
    %c0_13 = arith.constant 0 : index
    %c0_14 = arith.constant 0 : index
    %c0_15 = arith.constant 0 : index
    %31 = vector.load %arg4[%c0_13, %c0_14, %c0_15] : memref<2x3x8xf32, #tpu.memory_space<vmem>>, vector<2x3x1xf32>
    tpu.vector_store %arg4[%c0_13, %c0_14, %c0_15], %30 {strides = array<i32>} : memref<2x3x8xf32, #tpu.memory_space<vmem>>, vector<2x3x1xf32>,
    %32 = vector.extract_strided_slice %25 {offsets = [0, 1, 0], sizes = [2, 1, 128], strides = [1, 1, 1]} : vector<2x3x128xf32> to vector<2x1x128xf32>
    %33 = vector.broadcast %32 : vector<2x1x128xf32> to vector<2x3x128xf32>
    %34 = arith.mulf %21, %33 : vector<2x3x128xf32>
    %cst_16 = arith.constant dense<0.000000e+00> : vector<2x3xf32>
    %35 = vector.multi_reduction <add>, %34, %cst_16 [2] : vector<2x3x128xf32> to vector<2x3xf32>
    %36 = vector.shape_cast %35 : vector<2x3xf32> to vector<2x3x1xf32>
    %c0_17 = arith.constant 0 : index
    %c0_18 = arith.constant 0 : index
    %c1 = arith.constant 1 : index
    %37 = vector.load %arg4[%c0_17, %c0_18, %c1] : memref<2x3x8xf32, #tpu.memory_space<vmem>>, vector<2x3x1xf32>
    tpu.vector_store %arg4[%c0_17, %c0_18, %c1], %36 {strides = array<i32>} : memref<2x3x8xf32, #tpu.memory_space<vmem>>, vector<2x3x1xf32>,
    %38 = vector.extract_strided_slice %25 {offsets = [0, 2, 0], sizes = [2, 1, 128], strides = [1, 1, 1]} : vector<2x3x128xf32> to vector<2x1x128xf32>
    %39 = vector.broadcast %38 : vector<2x1x128xf32> to vector<2x3x128xf32>
    %40 = arith.mulf %21, %39 : vector<2x3x128xf32>
    %cst_19 = arith.constant dense<0.000000e+00> : vector<2x3xf32>
    %41 = vector.multi_reduction <add>, %40, %cst_19 [2] : vector<2x3x128xf32> to vector<2x3xf32>
    %42 = vector.shape_cast %41 : vector<2x3xf32> to vector<2x3x1xf32>
    %c0_20 = arith.constant 0 : index
    %c0_21 = arith.constant 0 : index
    %c2 = arith.constant 2 : index
    %43 = vector.load %arg4[%c0_20, %c0_21, %c2] : memref<2x3x8xf32, #tpu.memory_space<vmem>>, vector<2x3x1xf32>
    tpu.vector_store %arg4[%c0_20, %c0_21, %c2], %42 {strides = array<i32>} : memref<2x3x8xf32, #tpu.memory_space<vmem>>, vector<2x3x1xf32>,
    %c0_22 = arith.constant 0 : index
    %c0_23 = arith.constant 0 : index
    %c3 = arith.constant 3 : index
    %44 = vector.load %arg4[%c0_22, %c0_23, %c3] : memref<2x3x8xf32, #tpu.memory_space<vmem>>, vector<2x3x1xf32>
    tpu.vector_store %arg4[%c0_22, %c0_23, %c3], %15 {strides = array<i32>} : memref<2x3x8xf32, #tpu.memory_space<vmem>>, vector<2x3x1xf32>,
    %c0_24 = arith.constant 0 : index
    %c0_25 = arith.constant 0 : index
    %c4 = arith.constant 4 : index
    %45 = vector.load %arg4[%c0_24, %c0_25, %c4] : memref<2x3x8xf32, #tpu.memory_space<vmem>>, vector<2x3x1xf32>
    tpu.vector_store %arg4[%c0_24, %c0_25, %c4], %19 {strides = array<i32>} : memref<2x3x8xf32, #tpu.memory_space<vmem>>, vector<2x3x1xf32>,
    return
  }
  func.func @transform_0(%arg0: i32) -> (i32, i32, i32) {
    %c0_i32 = arith.constant 0 : i32
    %c0_i32_0 = arith.constant 0 : i32
    %c0_i32_1 = arith.constant 0 : i32
    return %arg0, %c0_i32, %c0_i32_0 : i32, i32, i32
  }
  func.func @transform_1(%arg0: i32) -> (i32, i32, i32) {
    %c0_i32 = arith.constant 0 : i32
    %c0_i32_0 = arith.constant 0 : i32
    %c0_i32_1 = arith.constant 0 : i32
    return %arg0, %c0_i32, %c0_i32_0 : i32, i32, i32
  }
  func.func @transform_2(%arg0: i32) -> (i32, i32, i32) {
    %c0_i32 = arith.constant 0 : i32
    %c0_i32_0 = arith.constant 0 : i32
    %c0_i32_1 = arith.constant 0 : i32
    return %arg0, %c0_i32, %c0_i32_0 : i32, i32, i32
  }
  func.func @transform_3(%arg0: i32) -> (i32, i32, i32) {
    %c0_i32 = arith.constant 0 : i32
    %c0_i32_0 = arith.constant 0 : i32
    %c0_i32_1 = arith.constant 0 : i32
    return %arg0, %c0_i32, %c0_i32_0 : i32, i32, i32
  }
}

</mosaic_0001>

<bundles_post_ra>
// kernel: tpu_custom_call.1
= control target key start
LH: loop header
LB: loop body
LE: loop exit
PB: predicated region body
PF: predicated region fallthrough
CT: control target
= control target key end

     0   :  { %vm22_vm0 = vcmask 1040384   ;;  %v39_v9 = vlaneseq  ;;  %vm51_vm1 = vcmask 1042432   ;;  %vm88_vm2 = vcmask 2048   ;;  %s221_s2 = inlined_call_operand.vmem [shape: f32[2,1,128], index: 2, kind: input, shape index: {}]   ;;  %s222_s1 = inlined_call_operand.vmem [shape: f32[2,3,128], index: 1, kind: input, shape index: {}]   ;;  %s223_s0 = inlined_call_operand.vmem [shape: f32[2,3,128], index: 0, kind: input, shape index: {}]   ;;  %s224_s3 = inlined_call_operand.vmem [shape: f32[2,3,8], index: 3, kind: output, shape index: {}]  }
   0x1   :  { %v18_v0 = vld [vmem:[%s221_s2] sm:$0x1]  ;;  %v19_v1 = vld [vmem:[%s221_s2 + $0x1] sm:$0x1]  ;;  %v15_v22 = vld [vmem:[%s223_s0 + $0x4] sm:$0x7] }
   0x2   :  { %v20_v2 = vand.u32 2147483647, %v18_v0  ;;  %v21_v3 = vand.u32 2147483647, %v19_v1  ;;  %v40_v11 = vshrl.u32 %v39_v9, 7  ;;  %vm107_vm3 = vcmask 10248  }
   0x3   :  { %v16_v15 = vld [vmem:[%s222_s1] sm:$0x7]  ;;  %v17_v26 = vld [vmem:[%s222_s1 + $0x4] sm:$0x7]  ;;  %vm126_vm4 = vcmask 18448   ;;  %vm129_vm5 = vcmask 26648  }
   0x4   :  { %v23_v4 = vsel %vm22_vm0, %v20_v2, 0.0  ;;  %v26_v5 = vsel %vm22_vm0, %v21_v3, 0.0  ;;  %v41_v12 = vsub.s32 0, %v40_v11  ;;  %v14_v16 = vld [vmem:[%s223_s0] sm:$0x7]  ;;  %v93_v33 = vsub.s32 1, %v40_v11 }
   0x5   :  { %24 = vadd.xlane.f32.xlu0 %v23_v4  ;;  %v112_v37 = vsub.s32 2, %v40_v11  ;;  %vm132_vm6 = vcmask 34848  }
   0x9   :  { %27 = vadd.xlane.f32.xlu0 %v26_v5 }
  0x92   :  { %v25_v6 = vpop.xlane.xlu0 %24 }
  0x93   :  { %v29_v7 = vadd.f32 0.0001, %v25_v6 }
  0x95   :  { %139 = vrcp.f32 %v29_v7 }
  0x96   :  { %v28_v8 = vpop.xlane.xlu0 %27 }
  0x97   :  { %v30_v10 = vadd.f32 0.0001, %v28_v8 }
  0x99   :  { %141 = vrcp.f32 %v30_v10 }
  0x9f   :  { %v140_v13 = vpop.eup %139 }
  0xa0   :  { %v35_v14 = vmul.f32 %v140_v13, %v18_v0 }
  0xa2   :  { %v42_v17 = vrot.slane %v35_v14, %v41_v12 }
  0xa3   :  { %v142_v18 = vpop.eup %141 }
  0xa4   :  { %v58_v19 = vmul.f32 %v42_v17, %v16_v15  ;;  %v49_v20 = vmul.f32 %v42_v17, %v14_v16  ;;  %v36_v21 = vmul.f32 %v142_v18, %v19_v1 }
  0xa6   :  { %v60_v23 = vsel %vm51_vm1, %v58_v19, 0.0  ;;  %v52_v24 = vsel %vm51_vm1, %v49_v20, 0.0  ;;  %v46_v25 = vrot.slane %v36_v21, %v41_v12 }
  0xa7   :  { %61 = vadd.xlane.f32.xlu0 %v60_v23  ;;  %53 = vadd.xlane.f32.xlu1 %v52_v24 }
  0xa8   :  { %v50_v27 = vmul.f32 %v46_v25, %v15_v22  ;;  %v59_v29 = vmul.f32 %v46_v25, %v17_v26 }
  0xaa   :  { %v55_v28 = vsel %vm51_vm1, %v50_v27, 0.0  ;;  %v63_v30 = vsel %vm51_vm1, %v59_v29, 0.0 }
  0xab   :  { %56 = vadd.xlane.f32.xlu1 %v55_v28 }
  0xaf   :  { %64 = vadd.xlane.f32.xlu1 %v63_v30 }
 0x134   :  { %v54_v31 = vpop.xlane.xlu1 %53  ;;  %v62_v34 = vpop.xlane.xlu0 %61 }
 0x135   :  { %v68_v32 = vsub.f32 %v14_v16, %v54_v31  ;;  %v66_v38 = vsub.f32 %v16_v15, %v62_v34 }
 0x137   :  { %v70_v35 = vmul.f32 %v68_v32, %v42_v17 }
 0x138   :  { %v57_v36 = vpop.xlane.xlu1 %56 }
 0x139   :  { %v69_v39 = vsub.f32 %v15_v22, %v57_v36  ;;  %v75_v40 = vrot.slane %v70_v35, %v41_v12  ;;  %v94_v41 = vrot.slane %v70_v35, %v93_v33  ;;  %v113_v45 = vrot.slane %v70_v35, %v112_v37 }
 0x13b   :  { %v71_v42 = vmul.f32 %v69_v39, %v46_v25  ;;  %v80_v43 = vmul.f32 %v75_v40, %v66_v38  ;;  %v99_v48 = vmul.f32 %v94_v41, %v66_v38  ;;  %v118_v52 = vmul.f32 %v113_v45, %v66_v38 }
 0x13c   :  { %v65_v44 = vpop.xlane.xlu1 %64 }
 0x13d   :  { %v67_v46 = vsub.f32 %v17_v26, %v65_v44  ;;  %v82_v47 = vsel %vm51_vm1, %v80_v43, 0.0  ;;  %v79_v49 = vrot.slane %v71_v42, %v41_v12  ;;  %v98_v50 = vrot.slane %v71_v42, %v93_v33 }
 0x13e   :  { %83 = vadd.xlane.f32.xlu0 %v82_v47  ;;  %v101_v53 = vsel %vm51_vm1, %v99_v48, 0.0  ;;  %v117_v56 = vrot.slane %v71_v42, %v112_v37  ;;  %v120_v57 = vsel %vm51_vm1, %v118_v52, 0.0 }
 0x13f   :  { %v81_v51 = vmul.f32 %v79_v49, %v67_v46  ;;  %v100_v55 = vmul.f32 %v98_v50, %v67_v46 }
 0x140   :  { %v119_v59 = vmul.f32 %v117_v56, %v67_v46 }
 0x141   :  { %v85_v54 = vsel %vm51_vm1, %v81_v51, 0.0  ;;  %v104_v58 = vsel %vm51_vm1, %v100_v55, 0.0 }
 0x142   :  { %102 = vadd.xlane.f32.xlu0 %v101_v53  ;;  %86 = vadd.xlane.f32.xlu1 %v85_v54  ;;  %v123_v60 = vsel %vm51_vm1, %v119_v59, 0.0 }
 0x146   :  { %121 = vadd.xlane.f32.xlu0 %v120_v57  ;;  %105 = vadd.xlane.f32.xlu1 %v104_v58 }
 0x14a   :  { %124 = vadd.xlane.f32.xlu1 %v123_v60 }
 0x1cb   :  { %v84_v61 = vpop.xlane.xlu0 %83 }
 0x1cc   :  { %89 = vst.msk [vmem:[%s224_s3] sm:$0x7] %vm88_vm2, %v84_v61 }
 0x1cf   :  { %v103_v62 = vpop.xlane.xlu0 %102  ;;  %v87_v63 = vpop.xlane.xlu1 %86 }
 0x1d0   :  { %108 = vst.msk [vmem:[%s224_s3] sm:$0x7] %vm107_vm3, %v103_v62 }
 0x1d1   :  { %90 = vst.msk [vmem:[%s224_s3 + $0x4] sm:$0x7] %vm88_vm2, %v87_v63 }
 0x1d3   :  { %v122_v0 = vpop.xlane.xlu0 %121  ;;  %v106_v1 = vpop.xlane.xlu1 %105 }
 0x1d4   :  { %127 = vst.msk [vmem:[%s224_s3] sm:$0x7] %vm126_vm4, %v122_v0 }
 0x1d5   :  { %109 = vst.msk [vmem:[%s224_s3 + $0x4] sm:$0x7] %vm107_vm3, %v106_v1 }
 0x1d6   :  { %130 = vst.msk [vmem:[%s224_s3] sm:$0x7] %vm129_vm5, %v54_v31 }
 0x1d7   :  { %133 = vst.msk [vmem:[%s224_s3] sm:$0x7] %vm132_vm6, %v62_v34  ;;  %v125_v2 = vpop.xlane.xlu1 %124 }
 0x1d8   :  { %128 = vst.msk [vmem:[%s224_s3 + $0x4] sm:$0x7] %vm126_vm4, %v125_v2 }
 0x1d9   :  { %131 = vst.msk [vmem:[%s224_s3 + $0x4] sm:$0x7] %vm129_vm5, %v57_v36 }
 0x1da   :  { %134 = vst.msk [vmem:[%s224_s3 + $0x4] sm:$0x7] %vm132_vm6, %v65_v44 }

</bundles_post_ra>
